<compile_context>
chip_gen: v6e
topology: v6e:2x2x1
jax: 0.10.0
libtpu: 0.0.40
codegen_flags: <defaults>
</compile_context>

<pallas_src>
import math

import jax
import jax.numpy as jnp
from jax.experimental import pallas as pl
from jax.experimental.pallas import tpu as pltpu


def _round_up(n, m):
    return ((n + m - 1) // m) * m


def _cdiv(a, b):
    return (a + b - 1) // b


def _make_dqn_kernel(tb, row_align):
    """Build a kernel body for a static batch tile of `tb` rows."""
    # Two independent row-halves -> two interleavable dependency chains.
    # Both halves stay aligned to the dtype's sublane packing (8 for f32,
    # 16 for bf16) so the static ref slices are layout-clean.
    if tb >= 2 * row_align:
        split = _round_up(tb // 2, row_align)
        row_slices = (slice(0, split), slice(split, tb))
    else:
        row_slices = (slice(0, tb),)

    def kernel(x_ref, w1_ref, b1_ref, w2_ref, b2_ref, w3_ref, b3_ref, o_ref):
        w1 = w1_ref[...]
        w2 = w2_ref[...]
        w3 = w3_ref[...]
        b1 = b1_ref[...]  # biases stay f32 (VPU bias-add / ReLU in f32)
        b2 = b2_ref[...]
        b3 = b3_ref[...]

        def mlp(x):
            # fc1 + ReLU: MXU matmul with f32 accumulation.
            h1 = jnp.dot(x, w1, preferred_element_type=jnp.float32)
            h1 = jnp.maximum(h1 + b1, 0.0)
            # fc2 + ReLU
            h2 = jnp.dot(h1.astype(w2.dtype), w2,
                         preferred_element_type=jnp.float32)
            h2 = jnp.maximum(h2 + b2, 0.0)
            # fc3 (no activation)
            out = jnp.dot(h2.astype(w3.dtype), w3,
                          preferred_element_type=jnp.float32)
            return out + b3

        for rows in row_slices:
            o_ref[rows, :] = mlp(x_ref[rows, :]).astype(o_ref.dtype)

    return kernel


def dqn_forward(x, params, *, tb_max=1024):
    """x: [B, input_dim].  params: dict from init_dqn_params (f32 or bf16 weights)."""
    w1, b1 = params["w1"], params["b1"]
    w2, b2 = params["w2"], params["b2"]
    w3, b3 = params["w3"], params["b3"]

    B, in_dim = x.shape
    assert in_dim == w1.shape[0]
    hidden = w1.shape[1]
    out_dim = w3.shape[1]

    # Cast activations to the weight compute dtype (no-op for f32 weights).
    x = x.astype(w1.dtype)
    row_align = 8 if x.dtype.itemsize >= 4 else 16  # sublane packing granularity

    # ---- Batch tiling ----------------------------------------------------
    #  * Large tiles (up to tb_max rows) amortize the ~0.35us per-step
    #    pipeline overhead (peak VMEM is < 1 MB even at TB=1024).
    #  * >= 2 grid steps whenever B > 8 so the "parallel" axis uses both
    #    TensorCores on v7x.
    #  * Balanced tile size minimizes zero-row padding waste.
    n_steps = max(_cdiv(B, tb_max), 2 if B > 8 else 1)
    TB = _round_up(_cdiv(B, n_steps), row_align)
    Bp = n_steps * TB

    if Bp != B:
        # Zero-fill only the ragged batch rows (inert; sliced off below).
        x = jnp.zeros((Bp, in_dim), x.dtype).at[:B, :].set(x)

    y = pl.pallas_call(
        _make_dqn_kernel(TB, row_align),
        out_shape=jax.ShapeDtypeStruct((Bp, out_dim), jnp.float32),
        grid=(n_steps,),
        in_specs=[
            # x streams through the pipeline, one (TB, in_dim) block per step.
            # Block last dim equals the full array dim -> no lane padding
            # of x in HBM is required.
            pl.BlockSpec((TB, in_dim), lambda i: (i, 0)),
            # Weights / biases: constant index_map -> fetched once, resident
            # in VMEM across all grid steps.
            pl.BlockSpec((in_dim, hidden), lambda i: (0, 0)),
            pl.BlockSpec((1, hidden), lambda i: (0, 0)),
            pl.BlockSpec((hidden, hidden), lambda i: (0, 0)),
            pl.BlockSpec((1, hidden), lambda i: (0, 0)),
            pl.BlockSpec((hidden, out_dim), lambda i: (0, 0)),
            pl.BlockSpec((1, out_dim), lambda i: (0, 0)),
        ],
        # True output width: avoids the 64x-inflated HBM writeback + the
        # extra lane-slice copy; masked stores of a (TB, out_dim) block are
        # far cheaper than the padded alternative at these sizes.
        out_specs=pl.BlockSpec((TB, out_dim), lambda i: (i, 0)),
        compiler_params=pltpu.CompilerParams(
            dimension_semantics=("parallel",),
        ),
    )(x, w1, b1, w2, b2, w3, b3)

    return y if Bp == B else y[:B]


def init_dqn_params(key, input_dim, output_dim, hidden=128,
                    weight_dtype=jnp.float32):
    """nn.Linear-style init: U(-1/sqrt(fan_in), +1/sqrt(fan_in)).

    Weights are stored as [in, out] (transpose of PyTorch's [out, in]) and may
    be bf16 (v6e/v7x MXU-native).  Biases stay f32 so bias-add / ReLU run in
    f32 on every chip (v5e has no bf16 VPU).
    """
    ks = jax.random.split(key, 6)

    def linear(kw, kb, fan_in, fan_out):
        bound = 1.0 / math.sqrt(fan_in)
        w = jax.random.uniform(kw, (fan_in, fan_out), jnp.float32, -bound, bound)
        b = jax.random.uniform(kb, (1, fan_out), jnp.float32, -bound, bound)
        return w.astype(weight_dtype), b

    w1, b1 = linear(ks[0], ks[1], input_dim, hidden)
    w2, b2 = linear(ks[2], ks[3], hidden, hidden)
    w3, b3 = linear(ks[4], ks[5], hidden, output_dim)
    return {"w1": w1, "b1": b1, "w2": w2, "b2": b2, "w3": w3, "b3": b3}


def dqn_reference(x, p):
    """Pure-JAX f32 reference."""
    h = jnp.maximum(x @ p["w1"].astype(jnp.float32) + p["b1"], 0.0)
    h = jnp.maximum(h @ p["w2"].astype(jnp.float32) + p["b2"], 0.0)
    return h @ p["w3"].astype(jnp.float32) + p["b3"]


if __name__ == "__main__":
    key = jax.random.PRNGKey(0)
    k_param, k_x1, k_x2 = jax.random.split(key, 3)

    # Typical DQN state/action sizes (CartPole-like): input_dim=4, output_dim=2
    input_dim, output_dim = 4, 2
    params = init_dqn_params(k_param, input_dim, output_dim)

    # Small per-step batch (single grid step).
    x_small = jax.random.normal(k_x1, (8, input_dim), jnp.float32)
    y_small = dqn_forward(x_small, params)
    jax.block_until_ready(y_small)
    assert y_small.shape == (8, output_dim)
    assert jnp.allclose(y_small, dqn_reference(x_small, params),
                        atol=1e-5, rtol=1e-5)

    # Replay-buffer-sized batch, not a tile multiple: exercises the balanced
    # 2-step grid (2 x 152 rows) with weights resident in VMEM and the
    # true-width (masked-lane) output.
    x_big = jax.random.normal(k_x2, (300, input_dim), jnp.float32)
    y_big = dqn_forward(x_big, params)
    jax.block_until_ready(y_big)
    assert y_big.shape == (300, output_dim)
    assert jnp.allclose(y_big, dqn_reference(x_big, params),
                        atol=1e-5, rtol=1e-5)

    # bf16 weights/activations (v6e / v7x MXU-native path); f32 accumulation,
    # f32 bias/ReLU/output.  Checked against the f32 reference loosely.
    params_bf16 = dict(params)
    for k in ("w1", "w2", "w3"):
        params_bf16[k] = params[k].astype(jnp.bfloat16)
    y_bf16 = dqn_forward(x_big, params_bf16)
    jax.block_until_ready(y_bf16)
    assert y_bf16.shape == (300, output_dim)
    assert jnp.allclose(y_bf16, dqn_reference(x_big, params),
                        atol=5e-2, rtol=5e-2)

    print("KERNEL_OK")
</pallas_src>

<mosaic_0001>
module attributes {stable_mosaic.version = 11 : i64} {
  func.func @kernel(%arg0: i32, %arg1: memref<8x4xf32, #tpu.memory_space<vmem>>, %arg2: memref<4x128xf32, #tpu.memory_space<vmem>>, %arg3: memref<1x128xf32, #tpu.memory_space<vmem>>, %arg4: memref<128x128xf32, #tpu.memory_space<vmem>>, %arg5: memref<1x128xf32, #tpu.memory_space<vmem>>, %arg6: memref<128x2xf32, #tpu.memory_space<vmem>>, %arg7: memref<1x2xf32, #tpu.memory_space<vmem>>, %arg8: memref<8x2xf32, #tpu.memory_space<vmem>>) attributes {dimension_semantics = [#tpu.dimension_semantics<parallel>], iteration_bounds = array<i64: 1>, scalar_prefetch = 0 : i64, scratch_operands = 0 : i64, tpu.core_type = #tpu.core_type<tc>, window_params = [{transform_indices = @transform_0, window_bounds = array<i64: 8, 4>}, {pipeline_mode = #tpu.pipeline_mode<synchronous>, transform_indices = @transform_1, window_bounds = array<i64: 4, 128>}, {pipeline_mode = #tpu.pipeline_mode<synchronous>, transform_indices = @transform_2, window_bounds = array<i64: 1, 128>}, {pipeline_mode = #tpu.pipeline_mode<synchronous>, transform_indices = @transform_3, window_bounds = array<i64: 128, 128>}, {pipeline_mode = #tpu.pipeline_mode<synchronous>, transform_indices = @transform_4, window_bounds = array<i64: 1, 128>}, {pipeline_mode = #tpu.pipeline_mode<synchronous>, transform_indices = @transform_5, window_bounds = array<i64: 128, 2>}, {pipeline_mode = #tpu.pipeline_mode<synchronous>, transform_indices = @transform_6, window_bounds = array<i64: 1, 2>}, {transform_indices = @transform_7, window_bounds = array<i64: 8, 2>}]} {
    %c0 = arith.constant 0 : index
    %c0_0 = arith.constant 0 : index
    %0 = vector.load %arg2[%c0, %c0_0] : memref<4x128xf32, #tpu.memory_space<vmem>>, vector<4x128xf32>
    %c0_1 = arith.constant 0 : index
    %c0_2 = arith.constant 0 : index
    %1 = vector.load %arg4[%c0_1, %c0_2] : memref<128x128xf32, #tpu.memory_space<vmem>>, vector<128x128xf32>
    %c0_3 = arith.constant 0 : index
    %c0_4 = arith.constant 0 : index
    %2 = vector.load %arg6[%c0_3, %c0_4] : memref<128x2xf32, #tpu.memory_space<vmem>>, vector<128x2xf32>
    %c0_5 = arith.constant 0 : index
    %c0_6 = arith.constant 0 : index
    %3 = vector.load %arg3[%c0_5, %c0_6] : memref<1x128xf32, #tpu.memory_space<vmem>>, vector<1x128xf32>
    %c0_7 = arith.constant 0 : index
    %c0_8 = arith.constant 0 : index
    %4 = vector.load %arg5[%c0_7, %c0_8] : memref<1x128xf32, #tpu.memory_space<vmem>>, vector<1x128xf32>
    %c0_9 = arith.constant 0 : index
    %c0_10 = arith.constant 0 : index
    %5 = vector.load %arg7[%c0_9, %c0_10] : memref<1x2xf32, #tpu.memory_space<vmem>>, vector<1x2xf32>
    %c0_11 = arith.constant 0 : index
    %c0_12 = arith.constant 0 : index
    %6 = vector.load %arg1[%c0_11, %c0_12] : memref<8x4xf32, #tpu.memory_space<vmem>>, vector<8x4xf32>
    %cst = arith.constant dense<0.000000e+00> : vector<8x128xf32>
    %7 = tpu.matmul %6, %0, %cst {dimension_numbers = #tpu.dot_dimension_numbers<[1], [0], [0], [1], [0, 0, 1, 1], [], []>} : vector<8x4xf32>, vector<4x128xf32>, vector<8x128xf32> -> vector<8x128xf32>
    %8 = vector.broadcast %3 : vector<1x128xf32> to vector<8x128xf32>
    %9 = arith.addf %7, %8 : vector<8x128xf32>
    %cst_13 = arith.constant 0.000000e+00 : f32
    %10 = vector.broadcast %cst_13 : f32 to vector<8x128xf32>
    %11 = arith.maximumf %9, %10 : vector<8x128xf32>
    %cst_14 = arith.constant dense<0.000000e+00> : vector<8x128xf32>
    %12 = tpu.matmul %11, %1, %cst_14 {dimension_numbers = #tpu.dot_dimension_numbers<[1], [0], [0], [1], [0, 0, 1, 1], [], []>} : vector<8x128xf32>, vector<128x128xf32>, vector<8x128xf32> -> vector<8x128xf32>
    %13 = vector.broadcast %4 : vector<1x128xf32> to vector<8x128xf32>
    %14 = arith.addf %12, %13 : vector<8x128xf32>
    %cst_15 = arith.constant 0.000000e+00 : f32
    %15 = vector.broadcast %cst_15 : f32 to vector<8x128xf32>
    %16 = arith.maximumf %14, %15 : vector<8x128xf32>
    %cst_16 = arith.constant dense<0.000000e+00> : vector<8x2xf32>
    %17 = tpu.matmul %16, %2, %cst_16 {dimension_numbers = #tpu.dot_dimension_numbers<[1], [0], [0], [1], [0, 0, 1, 1], [], []>} : vector<8x128xf32>, vector<128x2xf32>, vector<8x2xf32> -> vector<8x2xf32>
    %18 = vector.broadcast %5 : vector<1x2xf32> to vector<8x2xf32>
    %19 = arith.addf %17, %18 : vector<8x2xf32>
    %c0_17 = arith.constant 0 : index
    %c0_18 = arith.constant 0 : index
    %20 = vector.load %arg8[%c0_17, %c0_18] : memref<8x2xf32, #tpu.memory_space<vmem>>, vector<8x2xf32>
    tpu.vector_store %arg8[%c0_17, %c0_18], %19 {strides = array<i32>} : memref<8x2xf32, #tpu.memory_space<vmem>>, vector<8x2xf32>,
    return
  }
  func.func @transform_0(%arg0: i32) -> (i32, i32) {
    %c0_i32 = arith.constant 0 : i32
    %c0_i32_0 = arith.constant 0 : i32
    return %arg0, %c0_i32 : i32, i32
  }
  func.func @transform_1(%arg0: i32) -> (i32, i32) {
    %c0_i32 = arith.constant 0 : i32
    %c0_i32_0 = arith.constant 0 : i32
    %c0_i32_1 = arith.constant 0 : i32
    return %c0_i32, %c0_i32_0 : i32, i32
  }
  func.func @transform_2(%arg0: i32) -> (i32, i32) {
    %c0_i32 = arith.constant 0 : i32
    %c0_i32_0 = arith.constant 0 : i32
    %c0_i32_1 = arith.constant 0 : i32
    return %c0_i32, %c0_i32_0 : i32, i32
  }
  func.func @transform_3(%arg0: i32) -> (i32, i32) {
    %c0_i32 = arith.constant 0 : i32
    %c0_i32_0 = arith.constant 0 : i32
    %c0_i32_1 = arith.constant 0 : i32
    return %c0_i32, %c0_i32_0 : i32, i32
  }
  func.func @transform_4(%arg0: i32) -> (i32, i32) {
    %c0_i32 = arith.constant 0 : i32
    %c0_i32_0 = arith.constant 0 : i32
    %c0_i32_1 = arith.constant 0 : i32
    return %c0_i32, %c0_i32_0 : i32, i32
  }
  func.func @transform_5(%arg0: i32) -> (i32, i32) {
    %c0_i32 = arith.constant 0 : i32
    %c0_i32_0 = arith.constant 0 : i32
    %c0_i32_1 = arith.constant 0 : i32
    return %c0_i32, %c0_i32_0 : i32, i32
  }
  func.func @transform_6(%arg0: i32) -> (i32, i32) {
    %c0_i32 = arith.constant 0 : i32
    %c0_i32_0 = arith.constant 0 : i32
    %c0_i32_1 = arith.constant 0 : i32
    return %c0_i32, %c0_i32_0 : i32, i32
  }
  func.func @transform_7(%arg0: i32) -> (i32, i32) {
    %c0_i32 = arith.constant 0 : i32
    %c0_i32_0 = arith.constant 0 : i32
    return %arg0, %c0_i32 : i32, i32
  }
}

</mosaic_0001>

<bundles_post_ra>
// kernel: tpu_custom_call.1
= control target key start
LH: loop header
LB: loop body
LE: loop exit
PB: predicated region body
PF: predicated region fallthrough
CT: control target
= control target key end

     0   :  { %vm73_vm0 = vcmask 1043456   ;;  %vm69_vm1 = vcmask 31744   ;;  %v425_v0 = vmov 0.0   ;;  %vm426_vm2 = vmmov 0   ;;  %s620_s1 = inlined_call_operand.vmem [shape: f32[4,128], index: 1, kind: input, shape index: {}]   ;;  %s621_s0 = inlined_call_operand.vmem [shape: f32[8,4], index: 0, kind: input, shape index: {}]   ;;  %s622_s3 = inlined_call_operand.vmem [shape: f32[128,128], index: 3, kind: input, shape index: {}]   ;;  %s623_s5 = inlined_call_operand.vmem [shape: f32[128,2], index: 5, kind: input, shape index: {}]   ;;  %s624_s2 = inlined_call_operand.vmem [shape: f32[1,128], index: 2, kind: input, shape index: {}]   ;;  %s625_s4 = inlined_call_operand.vmem [shape: f32[1,128], index: 4, kind: input, shape index: {}]   ;;  %s626_s6 = inlined_call_operand.vmem [shape: f32[1,2], index: 6, kind: input, shape index: {}]   ;;  %s627_s7 = inlined_call_operand.vmem [shape: f32[8,2], index: 7, kind: output, shape index: {}]  }
   0x1   :  { %348 = vmatprep.subr.mxu0 %v425_v0  ;;  %v26_v1 = vld [vmem:[%s620_s1] sm:$0xf]  ;;  %350 = vmatprep.mubr.msk.f32.mxu0 %vm426_vm2, %v425_v0  ;;  %v42_v3 = vld [vmem:[%s622_s3 + $0x78] sm:$0xff]  ;;  %v41_v4 = vld [vmem:[%s622_s3 + $0x70] sm:$0xff]  ;;  %vm301_vm3 = vcmask 15360  }
   0x2   :  { %v62_v2 = vld [vmem:[%s621_s0] sm:$0xff]  ;;  %349 = vmatpush3.msk.msra.mxu0 %vm73_vm0, %v26_v1  ;;  %353 = vmatprep.subr.mxu1 %v425_v0  ;;  %v40_v5 = vld [vmem:[%s622_s3 + $0x68] sm:$0xff]  ;;  %v38_v7 = vld [vmem:[%s622_s3 + $0x58] sm:$0xff] }
   0x3   :  { %351 = vmatmul.mubr.msk.f32.vlgmr.msra.gmra.mxu0 %vm69_vm1, %v62_v2  ;;  %354 = vmatpush3.msra.mxu1 %v42_v3  ;;  %v39_v6 = vld [vmem:[%s622_s3 + $0x60] sm:$0xff]  ;;  %v37_v8 = vld [vmem:[%s622_s3 + $0x50] sm:$0xff]  ;;  %v36_v9 = vld [vmem:[%s622_s3 + $0x48] sm:$0xff] }
   0x4   :  { %355 = vmatprep.subr.mxu1 %v425_v0  ;;  %385 = vmatprep.mubr.msk.f32.mxu1 %vm426_vm2, %v425_v0  ;;  %v35_v10 = vld [vmem:[%s622_s3 + $0x40] sm:$0xff]  ;;  %v34_v11 = vld [vmem:[%s622_s3 + $0x38] sm:$0xff]  ;;  %v33_v12 = vld [vmem:[%s622_s3 + $0x30] sm:$0xff] }
   0x5   :  { %356 = vmatpush3.msra.mxu1 %v41_v4  ;;  %388 = vmatprep.subr.mxu0 %v425_v0  ;;  %v32_v13 = vld [vmem:[%s622_s3 + $0x28] sm:$0xff]  ;;  %v31_v14 = vld [vmem:[%s622_s3 + $0x20] sm:$0xff]  ;;  %v30_v15 = vld [vmem:[%s622_s3 + $0x18] sm:$0xff] }
   0x6   :  { %357 = vmatprep.subr.mxu1 %v425_v0  ;;  %420 = vmatprep.mubr.msk.f32.mxu0 %vm426_vm2, %v425_v0  ;;  %v29_v16 = vld [vmem:[%s622_s3 + $0x10] sm:$0xff]  ;;  %v28_v17 = vld [vmem:[%s622_s3 + $0x8] sm:$0xff]  ;;  %v27_v18 = vld [vmem:[%s622_s3] sm:$0xff] }
   0x7   :  { %358 = vmatpush3.msra.mxu1 %v40_v5  ;;  %v58_v19 = vld [vmem:[%s623_s5 + $0x78] sm:$0xff]  ;;  %v57_v20 = vld [vmem:[%s623_s5 + $0x70] sm:$0xff]  ;;  %v56_v21 = vld [vmem:[%s623_s5 + $0x68] sm:$0xff] }
   0x8   :  { %359 = vmatprep.subr.mxu1 %v425_v0  ;;  %389 = vmatpush3.msra.mxu0 %v58_v19  ;;  %v55_v22 = vld [vmem:[%s623_s5 + $0x60] sm:$0xff]  ;;  %v54_v23 = vld [vmem:[%s623_s5 + $0x58] sm:$0xff]  ;;  %v53_v24 = vld [vmem:[%s623_s5 + $0x50] sm:$0xff] }
   0x9   :  { %360 = vmatpush3.msra.mxu1 %v39_v6  ;;  %390 = vmatprep.subr.mxu0 %v425_v0  ;;  %v52_v25 = vld [vmem:[%s623_s5 + $0x48] sm:$0xff]  ;;  %v51_v26 = vld [vmem:[%s623_s5 + $0x40] sm:$0xff]  ;;  %v50_v27 = vld [vmem:[%s623_s5 + $0x38] sm:$0xff] }
   0xa   :  { %361 = vmatprep.subr.mxu1 %v425_v0  ;;  %391 = vmatpush3.msra.mxu0 %v57_v20  ;;  %v49_v28 = vld [vmem:[%s623_s5 + $0x30] sm:$0xff]  ;;  %v48_v29 = vld [vmem:[%s623_s5 + $0x28] sm:$0xff]  ;;  %v47_v30 = vld [vmem:[%s623_s5 + $0x20] sm:$0xff] }
   0xb   :  { %362 = vmatpush3.msra.mxu1 %v38_v7  ;;  %392 = vmatprep.subr.mxu0 %v425_v0  ;;  %v46_v31 = vld [vmem:[%s623_s5 + $0x18] sm:$0xff]  ;;  %v307_v32 = vld [vmem:[%s624_s2] ss:$0 sm:$0xff]  ;;  %v45_v37 = vld [vmem:[%s623_s5 + $0x10] sm:$0xff] }
   0xc   :  { %363 = vmatprep.subr.mxu1 %v425_v0  ;;  %393 = vmatpush3.msra.mxu0 %v56_v21  ;;  %v44_v38 = vld [vmem:[%s623_s5 + $0x8] sm:$0xff]  ;;  %v43_v39 = vld [vmem:[%s623_s5] sm:$0xff] }
   0xd   :  { %364 = vmatpush3.msra.mxu1 %v37_v8  ;;  %394 = vmatprep.subr.mxu0 %v425_v0  ;;  %v310_v40 = vld [vmem:[%s625_s4] ss:$0 sm:$0xff] }
   0xe   :  { %365 = vmatprep.subr.mxu1 %v425_v0  ;;  %395 = vmatpush3.msra.mxu0 %v55_v22  ;;  %v311_v45 = vld [vmem:[%s626_s6] ss:$0 sm:$0xff] }
   0xf   :  { %366 = vmatpush3.msra.mxu1 %v36_v9  ;;  %396 = vmatprep.subr.mxu0 %v425_v0 }
  0x10   :  { %367 = vmatprep.subr.mxu1 %v425_v0  ;;  %397 = vmatpush3.msra.mxu0 %v54_v23 }
  0x11   :  { %368 = vmatpush3.msra.mxu1 %v35_v10  ;;  %398 = vmatprep.subr.mxu0 %v425_v0 }
  0x12   :  { %369 = vmatprep.subr.mxu1 %v425_v0  ;;  %399 = vmatpush3.msra.mxu0 %v53_v24 }
  0x13   :  { %370 = vmatpush3.msra.mxu1 %v34_v11  ;;  %400 = vmatprep.subr.mxu0 %v425_v0 }
  0x14   :  { %371 = vmatprep.subr.mxu1 %v425_v0  ;;  %401 = vmatpush3.msra.mxu0 %v52_v25 }
  0x15   :  { %372 = vmatpush3.msra.mxu1 %v33_v12  ;;  %402 = vmatprep.subr.mxu0 %v425_v0 }
  0x16   :  { %373 = vmatprep.subr.mxu1 %v425_v0  ;;  %403 = vmatpush3.msra.mxu0 %v51_v26 }
  0x17   :  { %374 = vmatpush3.msra.mxu1 %v32_v13  ;;  %404 = vmatprep.subr.mxu0 %v425_v0 }
  0x18   :  { %375 = vmatprep.subr.mxu1 %v425_v0  ;;  %405 = vmatpush3.msra.mxu0 %v50_v27 }
  0x19   :  { %376 = vmatpush3.msra.mxu1 %v31_v14  ;;  %406 = vmatprep.subr.mxu0 %v425_v0 }
  0x1a   :  { %377 = vmatprep.subr.mxu1 %v425_v0  ;;  %407 = vmatpush3.msra.mxu0 %v49_v28 }
  0x1b   :  { %378 = vmatpush3.msra.mxu1 %v30_v15  ;;  %408 = vmatprep.subr.mxu0 %v425_v0 }
  0x1c   :  { %379 = vmatprep.subr.mxu1 %v425_v0  ;;  %409 = vmatpush3.msra.mxu0 %v48_v29 }
  0x1d   :  { %380 = vmatpush3.msra.mxu1 %v29_v16  ;;  %410 = vmatprep.subr.mxu0 %v425_v0 }
  0x1e   :  { %381 = vmatprep.subr.mxu1 %v425_v0  ;;  %411 = vmatpush3.msra.mxu0 %v47_v30 }
  0x1f   :  { %382 = vmatpush3.msra.mxu1 %v28_v17  ;;  %412 = vmatprep.subr.mxu0 %v425_v0 }
  0x20   :  { %383 = vmatprep.subr.mxu1 %v425_v0  ;;  %413 = vmatpush3.msra.mxu0 %v46_v31 }
  0x21   :  { %384 = vmatpush3.msra.mxu1 %v27_v18  ;;  %414 = vmatprep.subr.mxu0 %v425_v0 }
  0x22   :  { %415 = vmatpush3.msra.mxu0 %v45_v37 }
  0x23   :  { %416 = vmatprep.subr.mxu0 %v425_v0 }
  0x24   :  { %417 = vmatpush3.msra.mxu0 %v44_v38 }
  0x25   :  { %418 = vmatprep.subr.mxu0 %v425_v0 }
  0x26   :  { %419 = vmatpush3.msra.mxu0 %v43_v39 }
  0xc3   :  { %v143_v33 = vpop.f32.mrf.mxu0 }
  0xc4   :  { %v144_v34 = vadd.f32 %v307_v32, %v143_v33 }
  0xc5   :  { %v352_v35 = vpop.f32.mrf.mxu0 }
  0xc6   :  { %v147_v36 = vmax.f32 %v144_v34, 0.0 }
  0xc8   :  { %386 = vmatmul.mubr.f32.vlgmr.msra.gmra.mxu1 %v147_v36 }
 0x188   :  { %v220_v41 = vpop.f32.mrf.mxu1 }
 0x189   :  { %v221_v42 = vadd.f32 %v310_v40, %v220_v41 }
 0x18a   :  { %v387_v43 = vpop.f32.mrf.mxu1 }
 0x18b   :  { %v224_v44 = vmax.f32 %v221_v42, 0.0 }
 0x18d   :  { %421 = vmatmul.mubr.f32.vlgmr.msra.gmra.mxu0 %v224_v44 }
 0x24d   :  { %v297_v46 = vpop.f32.mrf.mxu0 }
 0x24e   :  { %v298_v47 = vadd.f32 %v311_v45, %v297_v46 }
 0x24f   :  { %v422_v48 = vpop.f32.mrf.mxu0 }
 0x250   :  { %302 = vst.msk [vmem:[%s627_s7] sm:$0xff] %vm301_vm3, %v298_v47 }

</bundles_post_ra>
